<compile_context>
chip_gen: v5e
topology: v5e:2x2
jax: 0.10.0
libtpu: 0.0.40
codegen_flags: <defaults>
</compile_context>

<pallas_src>
import functools
import math

import jax
import jax.numpy as jnp
from jax.experimental import pallas as pl
from jax.experimental.pallas import tpu as pltpu


def _round_up(x, m):
    return ((x + m - 1) // m) * m


def masked_linear_kernel(x_ref, w_ref, b_ref, o_ref, acc_ref):
    """One (tm, tn) output tile, accumulated over the k (reduction) grid axis."""
    k = pl.program_id(2)

    @pl.when(k == 0)
    def _init():
        acc_ref[...] = jnp.zeros_like(acc_ref)

    # x tile: (tm, tk), w tile: (tk, tn)  ->  MXU matmul, f32 accumulation.
    acc_ref[...] += jnp.dot(
        x_ref[...], w_ref[...], preferred_element_type=jnp.float32
    )

    @pl.when(k == pl.num_programs(2) - 1)
    def _finalize():
        # Bias add + downcast only once per output tile (epilogue).
        o_ref[...] = (acc_ref[...] + b_ref[...]).astype(o_ref.dtype)


def masked_linear(x, weight, mask, bias, *,
                  compute_dtype=jnp.bfloat16, tm=256, tn=256, tk=512):
    """y = x @ (weight * mask).T + bias  via a tiled Pallas TPU matmul.

    x:      (batch, dim_in)
    weight: (dim_out, dim_in)   -- torch.nn.Linear layout
    mask:   (dim_out, dim_in)
    bias:   (dim_out,)
    """
    batch, din = x.shape
    dout = weight.shape[0]
    out_dtype = x.dtype

    # Fuse the (static) mask into the weight once and pre-transpose to the
    # MXU-native (din, dout) layout. Cast operands to the compute dtype.
    wm = (weight * mask).T.astype(compute_dtype)          # (din, dout)
    xc = x.astype(compute_dtype)                          # (batch, din)
    b2 = bias.astype(jnp.float32).reshape(1, dout)        # (1, dout)

    # Clamp tiles to the (padded) problem size while keeping TPU tiling rules:
    # tm % 8 == 0, tn % 128 == 0, tk % 128 == 0.
    tm = min(tm, _round_up(batch, 8))
    tn = min(tn, _round_up(dout, 128))
    tk = min(tk, _round_up(din, 128))

    mp = _round_up(batch, tm)
    kp = _round_up(din, tk)
    np_ = _round_up(dout, tn)

    xc = jnp.pad(xc, ((0, mp - batch), (0, kp - din)))
    wm = jnp.pad(wm, ((0, kp - din), (0, np_ - dout)))
    b2 = jnp.pad(b2, ((0, 0), (0, np_ - dout)))

    grid = (mp // tm, np_ // tn, kp // tk)

    out = pl.pallas_call(
        masked_linear_kernel,
        out_shape=jax.ShapeDtypeStruct((mp, np_), out_dtype),
        grid_spec=pltpu.PrefetchScalarGridSpec(
            num_scalar_prefetch=0,
            grid=grid,
            in_specs=[
                pl.BlockSpec((tm, tk), lambda i, j, k: (i, k)),   # x
                pl.BlockSpec((tk, tn), lambda i, j, k: (k, j)),   # masked W^T
                pl.BlockSpec((1, tn), lambda i, j, k: (0, j)),    # bias row
            ],
            out_specs=pl.BlockSpec((tm, tn), lambda i, j, k: (i, j)),
            scratch_shapes=[pltpu.VMEM((tm, tn), jnp.float32)],
        ),
        compiler_params=pltpu.CompilerParams(
            dimension_semantics=("parallel", "parallel", "arbitrary"),
        ),
    )(xc, wm, b2)

    return out[:batch, :dout]


def _reference(x, weight, mask, bias):
    return x @ (weight * mask).T + bias


def _make_inputs(key, batch, din, dout):
    kx, kw, kb = jax.random.split(key, 3)
    bound = 1.0 / math.sqrt(din)
    weight = jax.random.uniform(kw, (dout, din), jnp.float32, -bound, bound)
    bias = jax.random.uniform(kb, (dout,), jnp.float32, -bound, bound)
    mask = jnp.tril(jnp.ones((dout, din), jnp.float32))   # MADE-style mask
    x = jax.random.normal(kx, (batch, din), jnp.float32)
    return x, weight, mask, bias


if __name__ == "__main__":
    key = jax.random.PRNGKey(0)
    k1, k2 = jax.random.split(key)

    # Case 1: small shapes matching the original module's demo.
    batch, din, dout = 8, 32, 32
    x, weight, mask, bias = _make_inputs(k1, batch, din, dout)
    out = jax.jit(masked_linear)(x, weight, mask, bias)
    out = jax.block_until_ready(out)
    ref = _reference(x, weight, mask, bias)
    assert out.shape == (batch, dout)
    assert jnp.allclose(out, ref, atol=5e-2, rtol=2e-2), "case 1 mismatch"

    # Case 2: non-aligned shapes + multi-step reduction (exercises padding,
    # the k-accumulator and the pl.when epilogue).
    batch, din, dout = 16, 160, 192
    x, weight, mask, bias = _make_inputs(k2, batch, din, dout)
    fn = jax.jit(functools.partial(masked_linear, tk=128))
    out = jax.block_until_ready(fn(x, weight, mask, bias))
    ref = _reference(x, weight, mask, bias)
    assert out.shape == (batch, dout)
    assert jnp.allclose(out, ref, atol=5e-2, rtol=2e-2), "case 2 mismatch"

    print("KERNEL_OK")
</pallas_src>

<mosaic_0001>
module attributes {stable_mosaic.version = 11 : i64} {
  func.func @masked_linear_kernel(%arg0: i32, %arg1: i32, %arg2: i32, %arg3: memref<8x128xbf16, #tpu.memory_space<vmem>>, %arg4: memref<128x128xbf16, #tpu.memory_space<vmem>>, %arg5: memref<1x128xf32, #tpu.memory_space<vmem>>, %arg6: memref<8x128xf32, #tpu.memory_space<vmem>>, %arg7: memref<8x128xf32, #tpu.memory_space<vmem>>) attributes {dimension_semantics = [#tpu.dimension_semantics<parallel>, #tpu.dimension_semantics<parallel>, #tpu.dimension_semantics<arbitrary>], iteration_bounds = array<i64: 1, 1, 1>, scalar_prefetch = 0 : i64, scratch_operands = 1 : i64, tpu.core_type = #tpu.core_type<tc>, window_params = [{transform_indices = @transform_0, window_bounds = array<i64: 8, 128>}, {transform_indices = @transform_1, window_bounds = array<i64: 128, 128>}, {transform_indices = @transform_2, window_bounds = array<i64: 1, 128>}, {transform_indices = @transform_3, window_bounds = array<i64: 8, 128>}]} {
    %c0_i32 = arith.constant 0 : i32
    %0 = arith.cmpi eq, %arg2, %c0_i32 : i32
    %1 = arith.extui %0 : i1 to i32
    %c0_i32_0 = arith.constant 0 : i32
    %2 = arith.cmpi ne, %1, %c0_i32_0 : i32
    scf.if %2 {
      %cst_10 = arith.constant 0.000000e+00 : f32
      %12 = vector.broadcast %cst_10 : f32 to vector<8x128xf32>
      %c0_11 = arith.constant 0 : index
      %c0_12 = arith.constant 0 : index
      %13 = vector.load %arg7[%c0_11, %c0_12] : memref<8x128xf32, #tpu.memory_space<vmem>>, vector<8x128xf32>
      tpu.vector_store %arg7[%c0_11, %c0_12], %12 {strides = array<i32>} : memref<8x128xf32, #tpu.memory_space<vmem>>, vector<8x128xf32>,
    } else {
    }
    %c0 = arith.constant 0 : index
    %c0_1 = arith.constant 0 : index
    %3 = vector.load %arg7[%c0, %c0_1] : memref<8x128xf32, #tpu.memory_space<vmem>>, vector<8x128xf32>
    %c0_2 = arith.constant 0 : index
    %c0_3 = arith.constant 0 : index
    %4 = vector.load %arg3[%c0_2, %c0_3] : memref<8x128xbf16, #tpu.memory_space<vmem>>, vector<8x128xbf16>
    %c0_4 = arith.constant 0 : index
    %c0_5 = arith.constant 0 : index
    %5 = vector.load %arg4[%c0_4, %c0_5] : memref<128x128xbf16, #tpu.memory_space<vmem>>, vector<128x128xbf16>
    %cst = arith.constant dense<0.000000e+00> : vector<8x128xf32>
    %6 = tpu.matmul %4, %5, %cst {dimension_numbers = #tpu.dot_dimension_numbers<[1], [0], [0], [1], [0, 0, 1, 1], [], []>} : vector<8x128xbf16>, vector<128x128xbf16>, vector<8x128xf32> -> vector<8x128xf32>
    %7 = arith.addf %3, %6 : vector<8x128xf32>
    %c0_6 = arith.constant 0 : index
    %c0_7 = arith.constant 0 : index
    %8 = vector.load %arg7[%c0_6, %c0_7] : memref<8x128xf32, #tpu.memory_space<vmem>>, vector<8x128xf32>
    tpu.vector_store %arg7[%c0_6, %c0_7], %7 {strides = array<i32>} : memref<8x128xf32, #tpu.memory_space<vmem>>, vector<8x128xf32>,
    %c0_i32_8 = arith.constant 0 : i32
    %9 = arith.cmpi eq, %arg2, %c0_i32_8 : i32
    %10 = arith.extui %9 : i1 to i32
    %c0_i32_9 = arith.constant 0 : i32
    %11 = arith.cmpi ne, %10, %c0_i32_9 : i32
    scf.if %11 {
      %c0_10 = arith.constant 0 : index
      %c0_11 = arith.constant 0 : index
      %12 = vector.load %arg7[%c0_10, %c0_11] : memref<8x128xf32, #tpu.memory_space<vmem>>, vector<8x128xf32>
      %c0_12 = arith.constant 0 : index
      %c0_13 = arith.constant 0 : index
      %13 = vector.load %arg5[%c0_12, %c0_13] : memref<1x128xf32, #tpu.memory_space<vmem>>, vector<1x128xf32>
      %14 = vector.broadcast %13 : vector<1x128xf32> to vector<8x128xf32>
      %15 = arith.addf %12, %14 : vector<8x128xf32>
      %c0_14 = arith.constant 0 : index
      %c0_15 = arith.constant 0 : index
      %16 = vector.load %arg6[%c0_14, %c0_15] : memref<8x128xf32, #tpu.memory_space<vmem>>, vector<8x128xf32>
      tpu.vector_store %arg6[%c0_14, %c0_15], %15 {strides = array<i32>} : memref<8x128xf32, #tpu.memory_space<vmem>>, vector<8x128xf32>,
    } else {
    }
    return
  }
  func.func @transform_0(%arg0: i32, %arg1: i32, %arg2: i32) -> (i32, i32) {
    %c0_i32 = arith.constant 0 : i32
    return %arg0, %arg2 : i32, i32
  }
  func.func @transform_1(%arg0: i32, %arg1: i32, %arg2: i32) -> (i32, i32) {
    %c0_i32 = arith.constant 0 : i32
    return %arg2, %arg1 : i32, i32
  }
  func.func @transform_2(%arg0: i32, %arg1: i32, %arg2: i32) -> (i32, i32) {
    %c0_i32 = arith.constant 0 : i32
    %c0_i32_0 = arith.constant 0 : i32
    return %c0_i32, %arg1 : i32, i32
  }
  func.func @transform_3(%arg0: i32, %arg1: i32, %arg2: i32) -> (i32, i32) {
    %c0_i32 = arith.constant 0 : i32
    return %arg0, %arg1 : i32, i32
  }
}

</mosaic_0001>

<bundles_post_ra>
// kernel: masked_linear.1
= control target key start
LH: loop header
LB: loop body
LE: loop exit
PB: predicated region body
PF: predicated region fallthrough
CT: control target
= control target key end

     0   :  { %s249_s0 = inlined_call_operand.vmem [shape: bf16[8,128], index: 0, kind: input, shape index: {}]   ;;  %s250_s1 = inlined_call_operand.vmem [shape: bf16[128,128], index: 1, kind: input, shape index: {}]   ;;  %s251_s2 = inlined_call_operand.vmem [shape: f32[1,128], index: 2, kind: input, shape index: {}]   ;;  %s252_s3 = inlined_call_operand.hbm [shape: f32[8,128], index: 3, kind: output, shape index: {}]  }
   0x1   :  { %v166_v0 = vld [vmem:[%s250_s1 + $0x38] sm:$0xff]  ;;  %v165_v1 = vld [vmem:[%s250_s1 + $0x30] sm:$0xff] }
   0x2   :  { %86 = vmatpush.bf16.msra.mxu0 %v166_v0 }
   0x3   :  { %8 = vsyncpa [#allocation4], 0  ;;  %v164_v2 = vld [vmem:[%s250_s1 + $0x28] sm:$0xff]  ;;  %v163_v3 = vld [vmem:[%s250_s1 + $0x20] sm:$0xff]  ;;  %s195_s5 = smov [#allocation3]   ;;  %s118_s9 = sshll.u32 %s252_s3, 4  ;;  %s119_s9 = int_to_ptr.hbm [resolvable:$true] %s118_s9 }
   0x4   :  { %v162_v4 = vld [vmem:[%s250_s1 + $0x18] sm:$0xff]  ;;  %v161_v5 = vld [vmem:[%s250_s1 + $0x10] sm:$0xff]  ;;  %v160_v6 = vld [vmem:[%s250_s1 + $0x8] sm:$0xff]  ;;  %s116_s6 = sshll.u32 %s195_s5, 4  ;;  %s117_s6 = int_to_ptr.vmem [resolvable:$true] %s116_s6 }
   0x5   :  { %v159_v7 = vld [vmem:[%s250_s1] sm:$0xff] }
   0x6   :  { %87 = vmatpush.bf16.msra.mxu0 %v165_v1  ;;  %v21_v8 = vld [vmem:[%s249_s0] sm:$0xf] }
   0x7   :  { %v168_v9 = vld [vmem:[%s251_s2] ss:$0 sm:$0xff] }
   0xa   :  { %88 = vmatpush.bf16.msra.mxu0 %v164_v2 }
   0xe   :  { %89 = vmatpush.bf16.msra.mxu0 %v163_v3 }
  0x12   :  { %90 = vmatpush.bf16.msra.mxu0 %v162_v4 }
  0x16   :  { %91 = vmatpush.bf16.msra.mxu0 %v161_v5 }
  0x1a   :  { %92 = vmatpush.bf16.msra.mxu0 %v160_v6 }
  0x1e   :  { %93 = vmatpush.bf16.msra.mxu0 %v159_v7 }
  0x21   :  { %94 = vmatmul.bf16.vlgmr.msra.gmra.mxu0 %v21_v8 }
  0x9e   :  { %v95_v10 = vpop.f32.mrf.mxu0 }
  0x9f   :  { %v109_v11 = vadd.f32 %v168_v9, %v95_v10 }
  0xa1   :  { %110 = vst [vmem:[#allocation3] sm:$0xff] %v109_v11 }
  0xa2   :  { %121 = dma.vmem_to_hbm [thread:$0]  %s117_s6, 128, %s119_s9, [#allocation4]  }
  0xa6   :  { %v97_v12 = vpop.f32.mrf.mxu0 }
  0xa7   :  { %193 = dma.done.wait [#allocation4], 128  }
  0xa8   :  { %194 = vsyncadd [#allocation4], 4294967168 }
  0xa9   :  { %126 = vsyncpa [#allocation4], 1 }

</bundles_post_ra>
